<compile_context>
chip_gen: v7x
topology: tpu7x:2x2x1
jax: 0.10.0
libtpu: 0.0.40
codegen_flags: <defaults>
</compile_context>

<pallas_src>
import functools

import jax
import jax.numpy as jnp
from jax.experimental import pallas as pl
from jax.experimental.pallas import tpu as pltpu

H1, H2 = 256, 512


def _round_up(x, m):
    return (x + m - 1) // m * m


def _leaky_relu(x, slope=0.2):
    return jnp.where(x > 0, x, slope * x)


def generator_kernel(z_ref, w1_ref, b1_ref, w2_ref, b2_ref, w3_ref, b3_ref, o_ref):
    # Layer 1: Linear(latent_dim -> 256) + LeakyReLU(0.2). bf16 in, f32 acc.
    h1 = jnp.dot(z_ref[...], w1_ref[...], preferred_element_type=jnp.float32)
    h1 = _leaky_relu(h1 + b1_ref[...])                       # f32 elementwise (VPU)
    # Layer 2: Linear(256 -> 512) + LeakyReLU(0.2).
    h2 = jnp.dot(h1.astype(jnp.bfloat16), w2_ref[...],
                 preferred_element_type=jnp.float32)
    h2 = _leaky_relu(h2 + b2_ref[...])
    # Layer 3: Linear(512 -> out_pad) + Tanh (EUP); bf16 lane-dense store.
    h3 = jnp.dot(h2.astype(jnp.bfloat16), w3_ref[...],
                 preferred_element_type=jnp.float32)
    o_ref[...] = jnp.tanh(h3 + b3_ref[...]).astype(o_ref.dtype)


def prepare_params(params):
    """One-time weight prep: bf16 casts + lane-padding of the output layer."""
    w1, b1 = params["w1"], params["b1"]
    w2, b2 = params["w2"], params["b2"]
    w3, b3 = params["w3"], params["b3"]
    out_dim = w3.shape[1]
    out_pad = _round_up(out_dim, 128)

    w3_p = jnp.zeros((w3.shape[0], out_pad), jnp.bfloat16)
    w3_p = w3_p.at[:, :out_dim].set(w3.astype(jnp.bfloat16))
    b3_p = jnp.zeros((1, out_pad), jnp.float32)
    b3_p = b3_p.at[:, :out_dim].set(jnp.reshape(b3, (1, -1)))

    prepared = {
        "w1": w1.astype(jnp.bfloat16),
        "b1": jnp.reshape(b1, (1, -1)).astype(jnp.float32),
        "w2": w2.astype(jnp.bfloat16),
        "b2": jnp.reshape(b2, (1, -1)).astype(jnp.float32),
        "w3": w3_p,
        "b3": b3_p,
    }
    return prepared, out_dim


def _choose_tb(batch, tb_max=512):
    """Batch tile: never bigger than the (16-rounded) batch; >=2 grid steps when
    the batch is big enough so v7x's second TensorCore gets work."""
    rb = _round_up(batch, 16)
    if rb <= tb_max:
        if rb > 256:
            return _round_up((rb + 1) // 2, 16)   # 2 parallel steps
        return rb
    return tb_max  # multiple of 256 -> fills MXU-M on v6e/v7x


@functools.partial(jax.jit, static_argnames=("out_dim", "tb"))
def _generator_pallas(z, prepared, *, out_dim, tb):
    w1, b1 = prepared["w1"], prepared["b1"]
    w2, b2 = prepared["w2"], prepared["b2"]
    w3, b3 = prepared["w3"], prepared["b3"]

    batch, latent_dim = z.shape
    h1d, h2d = w1.shape[1], w2.shape[1]
    out_pad = w3.shape[1]

    pb = _round_up(batch, tb)
    grid = (pb // tb,)

    # Only batch padding; K stays at latent_dim (last dim == full array dim,
    # so the (8,128) rule does not apply -- Mosaic lane-pads in VMEM).
    z_p = jnp.zeros((pb, latent_dim), jnp.bfloat16)
    z_p = z_p.at[:batch, :].set(z.astype(jnp.bfloat16))

    flops = 2 * pb * (latent_dim * h1d + h1d * h2d + h2d * out_pad)
    bytes_accessed = (
        pb * latent_dim * 2                              # z (bf16)
        + (w1.size + w2.size + w3.size) * 2              # weights (bf16)
        + (b1.size + b2.size + b3.size) * 4              # biases (f32)
        + pb * out_pad * 2                               # output (bf16)
    )
    cost = pl.CostEstimate(flops=flops, transcendentals=pb * out_pad,
                           bytes_accessed=bytes_accessed)

    const = lambda i: (0, 0)  # weights/biases: same block every batch tile
    resident = functools.partial(pl.BlockSpec, index_map=const,
                                 pipeline_mode=pl.Buffered(1))

    out = pl.pallas_call(
        generator_kernel,
        out_shape=jax.ShapeDtypeStruct((pb, out_pad), jnp.bfloat16),
        grid=grid,
        in_specs=[
            pl.BlockSpec((tb, latent_dim), lambda i: (i, 0)),   # z (batch-tiled)
            resident((latent_dim, h1d)),                        # w1 (resident)
            resident((1, h1d)),                                 # b1
            resident((h1d, h2d)),                               # w2
            resident((1, h2d)),                                 # b2
            resident((h2d, out_pad)),                           # w3
            resident((1, out_pad)),                             # b3
        ],
        out_specs=pl.BlockSpec((tb, out_pad), lambda i: (i, 0)),
        compiler_params=pltpu.CompilerParams(
            dimension_semantics=("parallel",),
        ),
        cost_estimate=cost,
    )(z_p, w1, b1, w2, b2, w3, b3)

    # Slice padding off; cast back to f32 for downstream use.
    return out[:batch, :out_dim].astype(jnp.float32)


def generator_forward(z, prepared, out_dim, *, tb_max=512):
    tb = _choose_tb(z.shape[0], tb_max)
    return _generator_pallas(z, prepared, out_dim=out_dim, tb=tb)


def init_params(key, latent_dim, output_size):
    """Deterministic init mimicking PyTorch nn.Linear default U(-1/sqrt(fan_in), +)."""
    def linear_init(k, fan_in, fan_out):
        kw, kb = jax.random.split(k)
        bound = 1.0 / jnp.sqrt(fan_in)
        w = jax.random.uniform(kw, (fan_in, fan_out), jnp.float32, -bound, bound)
        b = jax.random.uniform(kb, (1, fan_out), jnp.float32, -bound, bound)
        return w, b

    k1, k2, k3 = jax.random.split(key, 3)
    w1, b1 = linear_init(k1, latent_dim, H1)
    w2, b2 = linear_init(k2, H1, H2)
    w3, b3 = linear_init(k3, H2, output_size)
    return {"w1": w1, "b1": b1, "w2": w2, "b2": b2, "w3": w3, "b3": b3}


def generator_reference(z, params):
    """Pure-JAX f32 reference for correctness checking."""
    h = z @ params["w1"] + params["b1"]
    h = jnp.where(h > 0, h, 0.2 * h)
    h = h @ params["w2"] + params["b2"]
    h = jnp.where(h > 0, h, 0.2 * h)
    h = h @ params["w3"] + params["b3"]
    return jnp.tanh(h)


if __name__ == "__main__":
    latent_dim = 32
    output_size = 16
    batch = 8

    key = jax.random.PRNGKey(0)
    kz, kp = jax.random.split(key)
    z = jax.random.normal(kz, (batch, latent_dim), jnp.float32)
    params = init_params(kp, latent_dim, output_size)

    prepared, out_dim = prepare_params(params)   # one-time weight prep
    out = generator_forward(z, prepared, out_dim)
    out = jax.block_until_ready(out)

    ref = generator_reference(z, params)
    assert out.shape == (batch, output_size), out.shape
    # bf16 matmul inputs / bf16 output (f32 accumulation) -> loosened tolerance.
    assert jnp.allclose(out, ref, atol=5e-2, rtol=5e-2), (
        "mismatch vs reference: max abs diff = "
        f"{float(jnp.max(jnp.abs(out - ref)))}"
    )

    print("KERNEL_OK")
</pallas_src>

<mosaic_0001>
module attributes {stable_mosaic.version = 11 : i64} {
  func.func @generator_kernel(%arg0: i32, %arg1: memref<16x32xbf16, #tpu.memory_space<vmem>>, %arg2: memref<32x256xbf16, #tpu.memory_space<vmem>>, %arg3: memref<1x256xf32, #tpu.memory_space<vmem>>, %arg4: memref<256x512xbf16, #tpu.memory_space<vmem>>, %arg5: memref<1x512xf32, #tpu.memory_space<vmem>>, %arg6: memref<512x128xbf16, #tpu.memory_space<vmem>>, %arg7: memref<1x128xf32, #tpu.memory_space<vmem>>, %arg8: memref<16x128xbf16, #tpu.memory_space<vmem>>) attributes {dimension_semantics = [#tpu.dimension_semantics<parallel>], iteration_bounds = array<i64: 1>, scalar_prefetch = 0 : i64, scratch_operands = 0 : i64, tpu.core_type = #tpu.core_type<tc>, window_params = [{transform_indices = @transform_0, window_bounds = array<i64: 16, 32>}, {pipeline_mode = #tpu.pipeline_mode<synchronous>, transform_indices = @transform_1, window_bounds = array<i64: 32, 256>}, {pipeline_mode = #tpu.pipeline_mode<synchronous>, transform_indices = @transform_2, window_bounds = array<i64: 1, 256>}, {pipeline_mode = #tpu.pipeline_mode<synchronous>, transform_indices = @transform_3, window_bounds = array<i64: 256, 512>}, {pipeline_mode = #tpu.pipeline_mode<synchronous>, transform_indices = @transform_4, window_bounds = array<i64: 1, 512>}, {pipeline_mode = #tpu.pipeline_mode<synchronous>, transform_indices = @transform_5, window_bounds = array<i64: 512, 128>}, {pipeline_mode = #tpu.pipeline_mode<synchronous>, transform_indices = @transform_6, window_bounds = array<i64: 1, 128>}, {transform_indices = @transform_7, window_bounds = array<i64: 16, 128>}]} {
    %c0 = arith.constant 0 : index
    %c0_0 = arith.constant 0 : index
    %0 = vector.load %arg1[%c0, %c0_0] : memref<16x32xbf16, #tpu.memory_space<vmem>>, vector<16x32xbf16>
    %c0_1 = arith.constant 0 : index
    %c0_2 = arith.constant 0 : index
    %1 = vector.load %arg2[%c0_1, %c0_2] : memref<32x256xbf16, #tpu.memory_space<vmem>>, vector<32x256xbf16>
    %cst = arith.constant dense<0.000000e+00> : vector<16x256xf32>
    %2 = tpu.matmul %0, %1, %cst {dimension_numbers = #tpu.dot_dimension_numbers<[1], [0], [0], [1], [0, 0, 1, 1], [], []>} : vector<16x32xbf16>, vector<32x256xbf16>, vector<16x256xf32> -> vector<16x256xf32>
    %c0_3 = arith.constant 0 : index
    %c0_4 = arith.constant 0 : index
    %3 = vector.load %arg3[%c0_3, %c0_4] : memref<1x256xf32, #tpu.memory_space<vmem>>, vector<1x256xf32>
    %4 = vector.broadcast %3 : vector<1x256xf32> to vector<16x256xf32>
    %5 = arith.addf %2, %4 : vector<16x256xf32>
    %cst_5 = arith.constant 0.000000e+00 : f32
    %6 = vector.broadcast %cst_5 : f32 to vector<16x256xf32>
    %7 = arith.cmpf ogt, %5, %6 : vector<16x256xf32>
    %cst_6 = arith.constant 2.000000e-01 : f32
    %8 = vector.broadcast %cst_6 : f32 to vector<16x256xf32>
    %9 = arith.mulf %8, %5 : vector<16x256xf32>
    %10 = arith.select %7, %5, %9 : vector<16x256xi1>, vector<16x256xf32>
    %11 = arith.truncf %10 : vector<16x256xf32> to vector<16x256xbf16>
    %c0_7 = arith.constant 0 : index
    %c0_8 = arith.constant 0 : index
    %12 = vector.load %arg4[%c0_7, %c0_8] : memref<256x512xbf16, #tpu.memory_space<vmem>>, vector<256x512xbf16>
    %cst_9 = arith.constant dense<0.000000e+00> : vector<16x512xf32>
    %13 = tpu.matmul %11, %12, %cst_9 {dimension_numbers = #tpu.dot_dimension_numbers<[1], [0], [0], [1], [0, 0, 1, 1], [], []>} : vector<16x256xbf16>, vector<256x512xbf16>, vector<16x512xf32> -> vector<16x512xf32>
    %c0_10 = arith.constant 0 : index
    %c0_11 = arith.constant 0 : index
    %14 = vector.load %arg5[%c0_10, %c0_11] : memref<1x512xf32, #tpu.memory_space<vmem>>, vector<1x512xf32>
    %15 = vector.broadcast %14 : vector<1x512xf32> to vector<16x512xf32>
    %16 = arith.addf %13, %15 : vector<16x512xf32>
    %cst_12 = arith.constant 0.000000e+00 : f32
    %17 = vector.broadcast %cst_12 : f32 to vector<16x512xf32>
    %18 = arith.cmpf ogt, %16, %17 : vector<16x512xf32>
    %cst_13 = arith.constant 2.000000e-01 : f32
    %19 = vector.broadcast %cst_13 : f32 to vector<16x512xf32>
    %20 = arith.mulf %19, %16 : vector<16x512xf32>
    %21 = arith.select %18, %16, %20 : vector<16x512xi1>, vector<16x512xf32>
    %22 = arith.truncf %21 : vector<16x512xf32> to vector<16x512xbf16>
    %c0_14 = arith.constant 0 : index
    %c0_15 = arith.constant 0 : index
    %23 = vector.load %arg6[%c0_14, %c0_15] : memref<512x128xbf16, #tpu.memory_space<vmem>>, vector<512x128xbf16>
    %cst_16 = arith.constant dense<0.000000e+00> : vector<16x128xf32>
    %24 = tpu.matmul %22, %23, %cst_16 {dimension_numbers = #tpu.dot_dimension_numbers<[1], [0], [0], [1], [0, 0, 1, 1], [], []>} : vector<16x512xbf16>, vector<512x128xbf16>, vector<16x128xf32> -> vector<16x128xf32>
    %c0_17 = arith.constant 0 : index
    %c0_18 = arith.constant 0 : index
    %25 = vector.load %arg7[%c0_17, %c0_18] : memref<1x128xf32, #tpu.memory_space<vmem>>, vector<1x128xf32>
    %26 = vector.broadcast %25 : vector<1x128xf32> to vector<16x128xf32>
    %27 = arith.addf %24, %26 : vector<16x128xf32>
    %28 = math.tanh %27 : vector<16x128xf32>
    %29 = arith.truncf %28 : vector<16x128xf32> to vector<16x128xbf16>
    %c0_19 = arith.constant 0 : index
    %c0_20 = arith.constant 0 : index
    %30 = vector.load %arg8[%c0_19, %c0_20] : memref<16x128xbf16, #tpu.memory_space<vmem>>, vector<16x128xbf16>
    tpu.vector_store %arg8[%c0_19, %c0_20], %29 {strides = array<i32>} : memref<16x128xbf16, #tpu.memory_space<vmem>>, vector<16x128xbf16>,
    return
  }
  func.func @transform_0(%arg0: i32) -> (i32, i32) {
    %c0_i32 = arith.constant 0 : i32
    %c0_i32_0 = arith.constant 0 : i32
    return %arg0, %c0_i32 : i32, i32
  }
  func.func @transform_1(%arg0: i32) -> (i32, i32) {
    %c0_i32 = arith.constant 0 : i32
    %c0_i32_0 = arith.constant 0 : i32
    %c0_i32_1 = arith.constant 0 : i32
    return %c0_i32, %c0_i32_0 : i32, i32
  }
  func.func @transform_2(%arg0: i32) -> (i32, i32) {
    %c0_i32 = arith.constant 0 : i32
    %c0_i32_0 = arith.constant 0 : i32
    %c0_i32_1 = arith.constant 0 : i32
    return %c0_i32, %c0_i32_0 : i32, i32
  }
  func.func @transform_3(%arg0: i32) -> (i32, i32) {
    %c0_i32 = arith.constant 0 : i32
    %c0_i32_0 = arith.constant 0 : i32
    %c0_i32_1 = arith.constant 0 : i32
    return %c0_i32, %c0_i32_0 : i32, i32
  }
  func.func @transform_4(%arg0: i32) -> (i32, i32) {
    %c0_i32 = arith.constant 0 : i32
    %c0_i32_0 = arith.constant 0 : i32
    %c0_i32_1 = arith.constant 0 : i32
    return %c0_i32, %c0_i32_0 : i32, i32
  }
  func.func @transform_5(%arg0: i32) -> (i32, i32) {
    %c0_i32 = arith.constant 0 : i32
    %c0_i32_0 = arith.constant 0 : i32
    %c0_i32_1 = arith.constant 0 : i32
    return %c0_i32, %c0_i32_0 : i32, i32
  }
  func.func @transform_6(%arg0: i32) -> (i32, i32) {
    %c0_i32 = arith.constant 0 : i32
    %c0_i32_0 = arith.constant 0 : i32
    %c0_i32_1 = arith.constant 0 : i32
    return %c0_i32, %c0_i32_0 : i32, i32
  }
  func.func @transform_7(%arg0: i32) -> (i32, i32) {
    %c0_i32 = arith.constant 0 : i32
    %c0_i32_0 = arith.constant 0 : i32
    return %arg0, %c0_i32 : i32, i32
  }
}

</mosaic_0001>

<bundles_post_ra>
// kernel: _generator_pallas.1
= control target key start
LH: loop header
LB: loop body
LE: loop exit
PB: predicated region body
PF: predicated region fallthrough
CT: control target
= control target key end

     0   :  { %12 = vsyncpa [#allocation3], 0  ;;  %s1506_s0 = inlined_call_operand.vmem [shape: bf16[16,32], index: 0, kind: input, shape index: {}]   ;;  %s1507_s1 = inlined_call_operand.vmem [shape: bf16[32,256], index: 1, kind: input, shape index: {}]   ;;  %s1508_s2 = inlined_call_operand.vmem [shape: f32[1,256], index: 2, kind: input, shape index: {}]   ;;  %s1509_s3 = inlined_call_operand.hbm [shape: bf16[256,512], index: 3, kind: input, shape index: {}]   ;;  %s1510_s4 = inlined_call_operand.vmem [shape: f32[1,512], index: 4, kind: input, shape index: {}]   ;;  %s1511_s5 = inlined_call_operand.hbm [shape: bf16[512,128], index: 5, kind: input, shape index: {}]   ;;  %s1512_s6 = inlined_call_operand.vmem [shape: f32[1,128], index: 6, kind: input, shape index: {}]   ;;  %s1513_s7 = inlined_call_operand.vmem [shape: bf16[16,128], index: 7, kind: output, shape index: {}]  }
   0x1   :  { %13 = vsyncpa [#allocation5], 0  ;;  %s1392_s24 = smov [#allocation2]   ;;  %s1344_s28 = scalar_lea.hbm %s1509_s3, 8192 }
   0x2   :  { %s25_s25 = sshll.u32 %s1392_s24, 4  ;;  %p1345_p0 = scmp.ne.s32.totalorder %s1509_s3, %s1344_s28  ;;  %s26_s25 = int_to_ptr.vmem [resolvable:$true] %s25_s25 }
   0x3   :  { %p1348_p1 = scmp.lt.u32.totalorder %s1344_s28, %s1509_s3 }
   0x5   :  { %p1350_p2 = pnand %p1348_p1, %p1345_p0 }
   0x7   :  { %1353 = shalt.err (!%p1350_p2)
}
   0x8   :  { %s1354_s10 = scalar_lea.vmem %s26_s25, 8192  ;;  %p1359_p4 = scmp.lt.s32.totalorder %s26_s25, %s26_s25 }
   0x9   :  { %p1355_p3 = scmp.ne.s32.totalorder %s26_s25, %s1354_s10  ;;  %p1360_p5 = scmp.lt.s32.totalorder %s1354_s10, %s1354_s10 }
   0xb   :  { %p1361_p6 = por %p1360_p5, %p1359_p4 }
   0xd   :  { %p1362_p7 = pnand %p1361_p6, %p1355_p3 }
   0xf   :  { %1365 = shalt.err (!%p1362_p7)
}
  0x10   :  { %s1393_s11 = smov 256   ;;  %s1394_s12 = smov 16  }
  0x11   :  { %31 = dma.hbm_to_vmem [thread:$0]  %s1509_s3, 8192, %s26_s25, [#allocation3], %s1393_s11, %s1393_s11, %s1394_s12  }
  0x12   :  { %s1395_s15 = smov [#allocation4]   ;;  %s1366_s19 = scalar_lea.hbm %s1511_s5, 4096 }
  0x13   :  { %s39_s16 = sshll.u32 %s1395_s15, 4  ;;  %p1367_p8 = scmp.ne.s32.totalorder %s1511_s5, %s1366_s19  ;;  %s40_s16 = int_to_ptr.vmem [resolvable:$true] %s39_s16 }
  0x14   :  { %p1370_p9 = scmp.lt.u32.totalorder %s1366_s19, %s1511_s5 }
  0x16   :  { %p1372_p10 = pnand %p1370_p9, %p1367_p8 }
  0x18   :  { %1375 = shalt.err (!%p1372_p10)
}
  0x19   :  { %s1376_s24 = scalar_lea.vmem %s40_s16, 4096  ;;  %p1381_p12 = scmp.lt.s32.totalorder %s40_s16, %s40_s16 }
  0x1a   :  { %p1377_p11 = scmp.ne.s32.totalorder %s40_s16, %s1376_s24  ;;  %p1382_p13 = scmp.lt.s32.totalorder %s1376_s24, %s1376_s24 }
  0x1c   :  { %p1383_p0 = por %p1382_p13, %p1381_p12 }
  0x1e   :  { %p1384_p1 = pnand %p1383_p0, %p1377_p11 }
  0x20   :  { %1387 = shalt.err (!%p1384_p1)
}
  0x21   :  { %s1396_s3 = smov 64   ;;  %s1397_s25 = smov 4  }
  0x22   :  { %45 = dma.hbm_to_vmem [thread:$0]  %s1511_s5, 4096, %s40_s16, [#allocation5], %s1396_s3, %s1396_s3, %s1397_s25  }
  0x23   :  { %1388 = dma.done.wait [#allocation3], 8192  }
  0x24   :  { %1389 = vsyncadd [#allocation3], 4294959104 }
  0x25   :  { %1390 = dma.done.wait [#allocation5], 4096  }
  0x26   :  { %1391 = vsyncadd [#allocation5], 4294963200  ;;  %v1398_v0 = vmov 0   ;;  %v1205_v1 = vld [vmem:[%s1507_s1 + $0x4] ss:$8 sps:$4 sm:$0xff]   ;;  %vm98_vm0 = vcmask 261120  }
  0x27   :  { %134 = vmatprep.mubr.bf16.mxu0 %v1398_v0  ;;  %v1207_v2 = vld [vmem:[%s1507_s1] ss:$8 sps:$4 sm:$0xff]   ;;  %102 = vmatprep.subr.bf16.mxu0 %v1205_v1  ;;  %v1208_v3 = vld [vmem:[%s1507_s1 + $0x14] ss:$8 sps:$4 sm:$0xff]   ;;  %v1210_v4 = vld [vmem:[%s1507_s1 + $0x10] ss:$8 sps:$4 sm:$0xff]  }
  0x28   :  { %103 = vmatpush1.bf16.msra.mxu0 %v1207_v2  ;;  %v1211_v5 = vld [vmem:[%s1506_s0] sm:$0xff]   ;;  %v1214_v7 = vld [vmem:[#allocation2 + $0x8] ss:$16 sps:$4 sm:$0xff]   ;;  %v1216_v8 = vld [vmem:[#allocation2 + $0xc] ss:$16 sps:$4 sm:$0xff]  }
  0x29   :  { %104 = vmatprep.subr.bf16.mxu0 %v1208_v3  ;;  %v1212_v6 = vld [vmem:[#allocation2 + $0x4] ss:$16 sps:$4 sm:$0xff]   ;;  %v1217_v9 = vld [vmem:[#allocation2] ss:$16 sps:$4 sm:$0xff]   ;;  %v1222_v11 = vld [vmem:[#allocation2 + $0x2c] ss:$16 sps:$4 sm:$0xff]  }
  0x2a   :  { %565 = vmatprep.subr.bf16.mxu1 %v1212_v6  ;;  %v1218_v10 = vld [vmem:[#allocation2 + $0x24] ss:$16 sps:$4 sm:$0xff]   ;;  %v1223_v12 = vld [vmem:[#allocation2 + $0x20] ss:$16 sps:$4 sm:$0xff]   ;;  %v1220_v14 = vld [vmem:[#allocation2 + $0x28] ss:$16 sps:$4 sm:$0xff]  }
  0x2b   :  { %566 = vmatpush1.bf16.msra.mxu1 %v1217_v9  ;;  %v1224_v13 = vld [vmem:[#allocation2 + $0x44] ss:$16 sps:$4 sm:$0xff]   ;;  %v1228_v15 = vld [vmem:[#allocation2 + $0x4c] ss:$16 sps:$4 sm:$0xff]   ;;  %v1229_v16 = vld [vmem:[#allocation2 + $0x40] ss:$16 sps:$4 sm:$0xff]  }
  0x2c   :  { %105 = vmatpush1.bf16.msra.mxu0 %v1210_v4  ;;  %567 = vmatprep.subr.bf16.mxu1 %v1218_v10  ;;  %v1230_v17 = vld [vmem:[#allocation2 + $0x64] ss:$16 sps:$4 sm:$0xff]   ;;  %v1226_v18 = vld [vmem:[#allocation2 + $0x48] ss:$16 sps:$4 sm:$0xff]   ;;  %v1234_v19 = vld [vmem:[#allocation2 + $0x6c] ss:$16 sps:$4 sm:$0xff]  }
  0x2d   :  { %608 = vmatprep.subr.bf16.mxu0 %v1216_v8  ;;  %v1235_v20 = vld [vmem:[#allocation2 + $0x60] ss:$16 sps:$4 sm:$0xff]   ;;  %v1236_v21 = vld [vmem:[#allocation2 + $0x84] ss:$16 sps:$4 sm:$0xff]   ;;  %v1232_v22 = vld [vmem:[#allocation2 + $0x68] ss:$16 sps:$4 sm:$0xff]   ;;  %v63_v8 = vlaneseq }
  0x2e   :  { %v1240_v23 = vld [vmem:[#allocation2 + $0x8c] ss:$16 sps:$4 sm:$0xff]   ;;  %v1241_v24 = vld [vmem:[#allocation2 + $0x80] ss:$16 sps:$4 sm:$0xff]   ;;  %v1242_v25 = vld [vmem:[#allocation2 + $0xa4] ss:$16 sps:$4 sm:$0xff]  }
  0x2f   :  { %1047 = vmatmul.mubr.msk.bf16.vlgmr.msra.gmra.mrb[0].mxu0 %vm98_vm0, %v1211_v5  ;;  %568 = vmatpush1.bf16.msra.mxu1 %v1223_v12  ;;  %v1238_v26 = vld [vmem:[#allocation2 + $0x88] ss:$16 sps:$4 sm:$0xff]   ;;  %v1246_v27 = vld [vmem:[#allocation2 + $0xac] ss:$16 sps:$4 sm:$0xff]   ;;  %v1247_v28 = vld [vmem:[#allocation2 + $0xa0] ss:$16 sps:$4 sm:$0xff]  }
  0x30   :  { %609 = vmatpush1.bf16.msra.mxu0 %v1214_v7  ;;  %569 = vmatprep.subr.bf16.mxu1 %v1224_v13  ;;  %v1248_v29 = vld [vmem:[#allocation2 + $0xc4] ss:$16 sps:$4 sm:$0xff]   ;;  %v1244_v30 = vld [vmem:[#allocation2 + $0xa8] ss:$16 sps:$4 sm:$0xff]   ;;  %v1252_v31 = vld [vmem:[#allocation2 + $0xcc] ss:$16 sps:$4 sm:$0xff]  }
  0x31   :  { %610 = vmatprep.subr.bf16.mxu0 %v1222_v11  ;;  %v1253_v32 = vld [vmem:[#allocation2 + $0xc0] ss:$16 sps:$4 sm:$0xff]   ;;  %v1254_v33 = vld [vmem:[#allocation2 + $0xe4] ss:$16 sps:$4 sm:$0xff]   ;;  %v1250_v34 = vld [vmem:[#allocation2 + $0xc8] ss:$16 sps:$4 sm:$0xff]  }
  0x32   :  { %v1258_v35 = vld [vmem:[#allocation2 + $0xec] ss:$16 sps:$4 sm:$0xff]   ;;  %v1259_v36 = vld [vmem:[#allocation2 + $0xe0] ss:$16 sps:$4 sm:$0xff]   ;;  %v1260_v37 = vld [vmem:[#allocation2 + $0x104] ss:$16 sps:$4 sm:$0xff]  }
  0x33   :  { %570 = vmatpush1.bf16.msra.mxu1 %v1229_v16  ;;  %v1256_v38 = vld [vmem:[#allocation2 + $0xe8] ss:$16 sps:$4 sm:$0xff]   ;;  %v1264_v39 = vld [vmem:[#allocation2 + $0x10c] ss:$16 sps:$4 sm:$0xff]   ;;  %v1265_v40 = vld [vmem:[#allocation2 + $0x100] ss:$16 sps:$4 sm:$0xff]  }
  0x34   :  { %611 = vmatpush1.bf16.msra.mxu0 %v1220_v14  ;;  %571 = vmatprep.subr.bf16.mxu1 %v1230_v17  ;;  %v1262_v41 = vld [vmem:[#allocation2 + $0x108] ss:$16 sps:$4 sm:$0xff]   ;;  %v1266_v42 = vld [vmem:[#allocation2 + $0x124] ss:$16 sps:$4 sm:$0xff]   ;;  %v1270_v43 = vld [vmem:[#allocation2 + $0x12c] ss:$16 sps:$4 sm:$0xff]  }
  0x35   :  { %612 = vmatprep.subr.bf16.mxu0 %v1228_v15  ;;  %v1271_v44 = vld [vmem:[#allocation2 + $0x120] ss:$16 sps:$4 sm:$0xff]   ;;  %v1272_v45 = vld [vmem:[#allocation2 + $0x144] ss:$16 sps:$4 sm:$0xff]   ;;  %v1268_v46 = vld [vmem:[#allocation2 + $0x128] ss:$16 sps:$4 sm:$0xff]  }
  0x36   :  { %v1276_v47 = vld [vmem:[#allocation2 + $0x14c] ss:$16 sps:$4 sm:$0xff]   ;;  %v1277_v48 = vld [vmem:[#allocation2 + $0x140] ss:$16 sps:$4 sm:$0xff]   ;;  %v1278_v49 = vld [vmem:[#allocation2 + $0x164] ss:$16 sps:$4 sm:$0xff]  }
  0x37   :  { %572 = vmatpush1.bf16.msra.mxu1 %v1235_v20  ;;  %v1274_v50 = vld [vmem:[#allocation2 + $0x148] ss:$16 sps:$4 sm:$0xff]   ;;  %v1282_v51 = vld [vmem:[#allocation2 + $0x16c] ss:$16 sps:$4 sm:$0xff]   ;;  %v1283_v52 = vld [vmem:[#allocation2 + $0x160] ss:$16 sps:$4 sm:$0xff]  }
  0x38   :  { %613 = vmatpush1.bf16.msra.mxu0 %v1226_v18  ;;  %573 = vmatprep.subr.bf16.mxu1 %v1236_v21  ;;  %v1284_v53 = vld [vmem:[#allocation2 + $0x184] ss:$16 sps:$4 sm:$0xff]   ;;  %v1280_v54 = vld [vmem:[#allocation2 + $0x168] ss:$16 sps:$4 sm:$0xff]   ;;  %v1288_v55 = vld [vmem:[#allocation2 + $0x18c] ss:$16 sps:$4 sm:$0xff]  }
  0x39   :  { %614 = vmatprep.subr.bf16.mxu0 %v1234_v19  ;;  %v1289_v56 = vld [vmem:[#allocation2 + $0x180] ss:$16 sps:$4 sm:$0xff]   ;;  %v1286_v57 = vld [vmem:[#allocation2 + $0x188] ss:$16 sps:$4 sm:$0xff]   ;;  %v1290_v58 = vld [vmem:[#allocation2 + $0x1a4] ss:$16 sps:$4 sm:$0xff]  }
  0x3a   :  { %v1294_v59 = vld [vmem:[#allocation2 + $0x1ac] ss:$16 sps:$4 sm:$0xff]   ;;  %v1292_v60 = vld [vmem:[#allocation2 + $0x1a8] ss:$16 sps:$4 sm:$0xff]   ;;  %v1295_v61 = vld [vmem:[#allocation2 + $0x1a0] ss:$16 sps:$4 sm:$0xff]  }
  0x3b   :  { %574 = vmatpush1.bf16.msra.mxu1 %v1241_v24  ;;  %v1296_v62 = vld [vmem:[#allocation2 + $0x1c4] ss:$16 sps:$4 sm:$0xff]   ;;  %v1300_v63 = vld [vmem:[#allocation2 + $0x1cc] ss:$16 sps:$4 sm:$0xff]   ;;  %v1298_v0 = vld [vmem:[#allocation2 + $0x1c8] ss:$16 sps:$4 sm:$0xff]  }
  0x3c   :  { %615 = vmatpush1.bf16.msra.mxu0 %v1232_v22  ;;  %575 = vmatprep.subr.bf16.mxu1 %v1242_v25  ;;  %v1301_v1 = vld [vmem:[#allocation2 + $0x1c0] ss:$16 sps:$4 sm:$0xff]   ;;  %v1302_v2 = vld [vmem:[#allocation2 + $0x1e4] ss:$16 sps:$4 sm:$0xff]   ;;  %v1304_v3 = vld [vmem:[#allocation2 + $0x1e8] ss:$16 sps:$4 sm:$0xff]  }
  0x3d   :  { %616 = vmatprep.subr.bf16.mxu0 %v1240_v23  ;;  %v1306_v4 = vld [vmem:[#allocation2 + $0x1ec] ss:$16 sps:$4 sm:$0xff]   ;;  %v1307_v5 = vld [vmem:[#allocation2 + $0x1e0] ss:$16 sps:$4 sm:$0xff]   ;;  %v1478_v9 = vshrl.u32 %v63_v8, 7 }
  0x3e   :  { %v1308_v6 = vld [vmem:[#allocation4 + $0x40] sm:$0xff]  }
  0x3f   :  { %576 = vmatpush1.bf16.msra.mxu1 %v1247_v28  ;;  %v1309_v7 = vld [vmem:[#allocation4 + $0xc0] sm:$0xff]   ;;  %v65_v10 = vsub.s32 0, %v1478_v9  ;;  %v69_v12 = vsub.s32 1, %v1478_v9 }
  0x40   :  { %617 = vmatpush1.bf16.msra.mxu0 %v1238_v26  ;;  %577 = vmatprep.subr.bf16.mxu1 %v1248_v29  ;;  %v61_v11 = vld [vmem:[%s1508_s2] sm:$0x3] }
  0x41   :  { %618 = vmatprep.subr.bf16.mxu0 %v1246_v27  ;;  %v66_v13 = vrot.slane %v61_v11, %v65_v10  ;;  %v70_v14 = vrot.slane %v61_v11, %v69_v12 }
  0x43   :  { %578 = vmatpush1.bf16.msra.mxu1 %v1253_v32 }
  0x44   :  { %619 = vmatpush1.bf16.msra.mxu0 %v1244_v30  ;;  %579 = vmatprep.subr.bf16.mxu1 %v1254_v33  ;;  %v1310_v33 = vld [vmem:[#allocation4] sm:$0xff]  }
  0x45   :  { %620 = vmatprep.subr.bf16.mxu0 %v1252_v31 }
  0x47   :  { %580 = vmatpush1.bf16.msra.mxu1 %v1259_v36  ;;  %v1313_v36 = vld [vmem:[#allocation4 + $0xc8] sm:$0xff]  }
  0x48   :  { %621 = vmatpush1.bf16.msra.mxu0 %v1250_v34  ;;  %581 = vmatprep.subr.bf16.mxu1 %v1260_v37  ;;  %v1311_v34 = vld [vmem:[#allocation4 + $0x80] sm:$0xff]   ;;  %v1314_v37 = vld [vmem:[#allocation4 + $0x8] sm:$0xff]  }
  0x49   :  { %622 = vmatprep.subr.bf16.mxu0 %v1258_v35  ;;  %v1312_v35 = vld [vmem:[#allocation4 + $0x48] sm:$0xff]  }
  0x4b   :  { %582 = vmatpush1.bf16.msra.mxu1 %v1265_v40  ;;  %v1317_v40 = vld [vmem:[#allocation4 + $0xd0] sm:$0xff]  }
  0x4c   :  { %623 = vmatpush1.bf16.msra.mxu0 %v1256_v38  ;;  %583 = vmatprep.subr.bf16.mxu1 %v1266_v42  ;;  %v1315_v38 = vld [vmem:[#allocation4 + $0x88] sm:$0xff]   ;;  %v1319_v42 = vld [vmem:[#allocation4 + $0x90] sm:$0xff]  }
  0x4d   :  { %624 = vmatprep.subr.bf16.mxu0 %v1264_v39  ;;  %v1316_v39 = vld [vmem:[#allocation4 + $0x50] sm:$0xff]  }
  0x4f   :  { %584 = vmatpush1.bf16.msra.mxu1 %v1271_v44  ;;  %v1321_v44 = vld [vmem:[#allocation4 + $0xd8] sm:$0xff]  }
  0x50   :  { %625 = vmatpush1.bf16.msra.mxu0 %v1262_v41  ;;  %585 = vmatprep.subr.bf16.mxu1 %v1272_v45  ;;  %v1318_v41 = vld [vmem:[#allocation4 + $0x10] sm:$0xff]   ;;  %v1322_v45 = vld [vmem:[#allocation4 + $0x18] sm:$0xff]  }
  0x51   :  { %626 = vmatprep.subr.bf16.mxu0 %v1270_v43  ;;  %v1320_v43 = vld [vmem:[#allocation4 + $0x58] sm:$0xff]  }
  0x53   :  { %586 = vmatpush1.bf16.msra.mxu1 %v1277_v48  ;;  %v1325_v48 = vld [vmem:[#allocation4 + $0xe0] sm:$0xff]  }
  0x54   :  { %627 = vmatpush1.bf16.msra.mxu0 %v1268_v46  ;;  %587 = vmatprep.subr.bf16.mxu1 %v1278_v49  ;;  %v1323_v46 = vld [vmem:[#allocation4 + $0x98] sm:$0xff]   ;;  %v1326_v49 = vld [vmem:[#allocation4 + $0x20] sm:$0xff]  }
  0x55   :  { %628 = vmatprep.subr.bf16.mxu0 %v1276_v47  ;;  %v1324_v47 = vld [vmem:[#allocation4 + $0x60] sm:$0xff]  }
  0x57   :  { %588 = vmatpush1.bf16.msra.mxu1 %v1283_v52  ;;  %v1329_v52 = vld [vmem:[#allocation4 + $0xe8] sm:$0xff]  }
  0x58   :  { %629 = vmatpush1.bf16.msra.mxu0 %v1274_v50  ;;  %589 = vmatprep.subr.bf16.mxu1 %v1284_v53  ;;  %v1327_v50 = vld [vmem:[#allocation4 + $0xa0] sm:$0xff]   ;;  %v1330_v53 = vld [vmem:[#allocation4 + $0x28] sm:$0xff]  }
  0x59   :  { %630 = vmatprep.subr.bf16.mxu0 %v1282_v51  ;;  %v1328_v51 = vld [vmem:[#allocation4 + $0x68] sm:$0xff]  }
  0x5b   :  { %590 = vmatpush1.bf16.msra.mxu1 %v1289_v56  ;;  %v1333_v56 = vld [vmem:[#allocation4 + $0xf0] sm:$0xff]  }
  0x5c   :  { %631 = vmatpush1.bf16.msra.mxu0 %v1280_v54  ;;  %591 = vmatprep.subr.bf16.mxu1 %v1290_v58  ;;  %v1331_v54 = vld [vmem:[#allocation4 + $0xa8] sm:$0xff]   ;;  %v1335_v58 = vld [vmem:[#allocation4 + $0xb0] sm:$0xff]  }
  0x5d   :  { %632 = vmatprep.subr.bf16.mxu0 %v1288_v55  ;;  %v1332_v55 = vld [vmem:[#allocation4 + $0x70] sm:$0xff]  }
  0x5f   :  { %592 = vmatpush1.bf16.msra.mxu1 %v1295_v61  ;;  %v1338_v61 = vld [vmem:[#allocation4 + $0x38] sm:$0xff]  }
  0x60   :  { %633 = vmatpush1.bf16.msra.mxu0 %v1286_v57  ;;  %593 = vmatprep.subr.bf16.mxu1 %v1296_v62  ;;  %v1334_v57 = vld [vmem:[#allocation4 + $0x30] sm:$0xff]   ;;  %v1339_v62 = vld [vmem:[#allocation4 + $0xb8] sm:$0xff]  }
  0x61   :  { %634 = vmatprep.subr.bf16.mxu0 %v1294_v59  ;;  %v1336_v59 = vld [vmem:[#allocation4 + $0x78] sm:$0xff]  }
  0x63   :  { %594 = vmatpush1.bf16.msra.mxu1 %v1301_v1  ;;  %v239_v1 = vsub.s32 3, %v1478_v9 }
  0x64   :  { %635 = vmatpush1.bf16.msra.mxu0 %v1292_v60  ;;  %595 = vmatprep.subr.bf16.mxu1 %v1302_v2  ;;  %v1337_v60 = vld [vmem:[#allocation4 + $0xf8] sm:$0xff]  }
  0x65   :  { %636 = vmatprep.subr.bf16.mxu0 %v1300_v63  ;;  %v235_v63 = vsub.s32 2, %v1478_v9 }
  0x67   :  { %596 = vmatpush1.bf16.msra.mxu1 %v1307_v5 }
  0x68   :  { %637 = vmatpush1.bf16.msra.mxu0 %v1298_v0  ;;  %1154 = vmatprep.subr.bf16.mxu1 %v1308_v6  ;;  %v223_v0 = vld [vmem:[%s1510_s4] sm:$0xf] }
  0x69   :  { %638 = vmatprep.subr.bf16.mxu0 %v1306_v4  ;;  %v228_v2 = vrot.slane %v223_v0, %v65_v10  ;;  %v232_v4 = vrot.slane %v223_v0, %v69_v12  ;;  %v240_v5 = vrot.slane %v223_v0, %v239_v1 }
  0x6c   :  { %639 = vmatpush1.bf16.msra.mxu0 %v1304_v3  ;;  %v236_v3 = vrot.slane %v223_v0, %v235_v63 }
  0x6d   :  { %1176 = vmatprep.subr.bf16.mxu0 %v1309_v7 }
 0x102   :  { %v136_v15 = vpop.f32.mrb[0].mxu0 }
 0x103   :  { %v137_v16 = vadd.f32 %v136_v15, %v66_v13  ;;  %v138_v17 = vpop.f32.mrb[1].mxu0 }
 0x104   :  { %v139_v18 = vadd.f32 %v138_v17, %v70_v14  ;;  %v140_v19 = vpop.f32.mrb[2].mxu0 }
 0x105   :  { %v149_v20 = vmul.f32 0.2, %v137_v16  ;;  %v141_v21 = vadd.f32 %v140_v19, %v66_v13  ;;  %v142_v22 = vpop.f32.mrb[3].mxu0  ;;  %vm145_vm1 = vcmp.gt.f32.partialorder %v137_v16, 0.0 }
 0x106   :  { %v150_v23 = vmul.f32 0.2, %v139_v18  ;;  %v143_v24 = vadd.f32 %v142_v22, %v70_v14  ;;  %vm146_vm3 = vcmp.gt.f32.partialorder %v139_v18, 0.0 }
 0x107   :  { %vm147_vm2 = vcmp.gt.f32.partialorder %v141_v21, 0.0  ;;  %v151_v25 = vmul.f32 0.2, %v141_v21  ;;  %v153_v27 = vsel %vm145_vm1, %v137_v16, %v149_v20 }
 0x108   :  { %v152_v26 = vmul.f32 0.2, %v143_v24  ;;  %vm148_vm4 = vcmp.gt.f32.partialorder %v143_v24, 0.0  ;;  %v154_v29 = vsel %vm146_vm3, %v139_v18, %v150_v23 }
 0x109   :  { %v155_v28 = vsel %vm147_vm2, %v141_v21, %v151_v25 }
 0x10a   :  { %v156_v30 = vsel %vm148_vm4, %v143_v24, %v152_v26  ;;  %v157_v31 = vpack.c.bf16 %v155_v28, %v153_v27 }
 0x10b   :  { %v158_v32 = vpack.c.bf16 %v156_v30, %v154_v29 }
 0x10d   :  { %597 = vmatprep.mubr.bf16.mxu1 %v158_v32  ;;  %640 = vmatprep.mubr.bf16.mxu0 %v158_v32 }
 0x10e   :  { %598 = vmatmul.mubr.bf16.vlgmr.msra.gmra.mrb[0].mxu1 %v157_v31  ;;  %641 = vmatmul.mubr.bf16.vlgmr.msra.gmra.mrb[4].mxu0 %v157_v31 }
 0x10f   :  { %1155 = vmatpush3.bf16.msra.mxu1 %v1310_v33  ;;  %1177 = vmatpush3.bf16.msra.mxu0 %v1311_v34 }
 0x110   :  { %1156 = vmatprep.subr.bf16.mxu1 %v1312_v35  ;;  %1178 = vmatprep.subr.bf16.mxu0 %v1313_v36 }
 0x113   :  { %1157 = vmatpush3.bf16.msra.mxu1 %v1314_v37  ;;  %1179 = vmatpush3.bf16.msra.mxu0 %v1315_v38 }
 0x114   :  { %1158 = vmatprep.subr.bf16.mxu1 %v1316_v39  ;;  %1180 = vmatprep.subr.bf16.mxu0 %v1317_v40 }
 0x117   :  { %1159 = vmatpush3.bf16.msra.mxu1 %v1318_v41  ;;  %1181 = vmatpush3.bf16.msra.mxu0 %v1319_v42 }
 0x118   :  { %1160 = vmatprep.subr.bf16.mxu1 %v1320_v43  ;;  %1182 = vmatprep.subr.bf16.mxu0 %v1321_v44  ;;  %v1112_v44 = vld [vmem:[%s1512_s6] ss:$0 sm:$0xff] }
 0x11b   :  { %1161 = vmatpush3.bf16.msra.mxu1 %v1322_v45  ;;  %1183 = vmatpush3.bf16.msra.mxu0 %v1323_v46 }
 0x11c   :  { %1162 = vmatprep.subr.bf16.mxu1 %v1324_v47  ;;  %1184 = vmatprep.subr.bf16.mxu0 %v1325_v48 }
 0x11f   :  { %1163 = vmatpush3.bf16.msra.mxu1 %v1326_v49  ;;  %1185 = vmatpush3.bf16.msra.mxu0 %v1327_v50 }
 0x120   :  { %1164 = vmatprep.subr.bf16.mxu1 %v1328_v51  ;;  %1186 = vmatprep.subr.bf16.mxu0 %v1329_v52 }
 0x123   :  { %1165 = vmatpush3.bf16.msra.mxu1 %v1330_v53  ;;  %1187 = vmatpush3.bf16.msra.mxu0 %v1331_v54 }
 0x124   :  { %1166 = vmatprep.subr.bf16.mxu1 %v1332_v55  ;;  %1188 = vmatprep.subr.bf16.mxu0 %v1333_v56 }
 0x127   :  { %1167 = vmatpush3.bf16.msra.mxu1 %v1334_v57  ;;  %1189 = vmatpush3.bf16.msra.mxu0 %v1335_v58 }
 0x128   :  { %1168 = vmatprep.subr.bf16.mxu1 %v1336_v59  ;;  %1190 = vmatprep.subr.bf16.mxu0 %v1337_v60 }
 0x12b   :  { %1169 = vmatpush3.bf16.msra.mxu1 %v1338_v61  ;;  %1191 = vmatpush3.bf16.msra.mxu0 %v1339_v62 }
 0x1e1   :  { %v599_v6 = vpop.f32.mrb[0].mxu1  ;;  %v642_v7 = vpop.f32.mrb[4].mxu0 }
 0x1e2   :  { %v600_v8 = vadd.f32 %v599_v6, %v228_v2  ;;  %v643_v11 = vadd.f32 %v642_v7, %v236_v3  ;;  %v601_v13 = vpop.f32.mrb[1].mxu1  ;;  %v644_v14 = vpop.f32.mrb[5].mxu0 }
 0x1e3   :  { %v602_v15 = vadd.f32 %v601_v13, %v232_v4  ;;  %v645_v16 = vadd.f32 %v644_v14, %v240_v5  ;;  %v603_v17 = vpop.f32.mrb[2].mxu1  ;;  %v646_v18 = vpop.f32.mrb[6].mxu0 }
 0x1e4   :  { %vm651_vm5 = vcmp.gt.f32.partialorder %v600_v8, 0.0  ;;  %v659_v19 = vmul.f32 0.2, %v600_v8  ;;  %vm653_vm6 = vcmp.gt.f32.partialorder %v643_v11, 0.0  ;;  %v661_v20 = vmul.f32 0.2, %v643_v11 }
 0x1e5   :  { %vm652_vm7 = vcmp.gt.f32.partialorder %v602_v15, 0.0  ;;  %v660_v10 = vmul.f32 0.2, %v602_v15  ;;  %vm654_vm8 = vcmp.gt.f32.partialorder %v645_v16, 0.0  ;;  %v662_v9 = vmul.f32 0.2, %v645_v16 }
 0x1e6   :  { %v604_v12 = vadd.f32 %v603_v17, %v228_v2  ;;  %v647_v21 = vadd.f32 %v646_v18, %v236_v3  ;;  %v605_v22 = vpop.f32.mrb[3].mxu1  ;;  %v648_v23 = vpop.f32.mrb[7].mxu0  ;;  %v667_v24 = vsel %vm651_vm5, %v600_v8, %v659_v19  ;;  %v669_v25 = vsel %vm653_vm6, %v643_v11, %v661_v20 }
 0x1e7   :  { %v606_v26 = vadd.f32 %v605_v22, %v232_v4  ;;  %v649_v27 = vadd.f32 %v648_v23, %v240_v5  ;;  %v668_v34 = vsel %vm652_vm7, %v602_v15, %v660_v10  ;;  %v670_v35 = vsel %vm654_vm8, %v645_v16, %v662_v9 }
 0x1e8   :  { %vm655_vm9 = vcmp.gt.f32.partialorder %v604_v12, 0.0  ;;  %v663_v28 = vmul.f32 0.2, %v604_v12  ;;  %vm657_vm10 = vcmp.gt.f32.partialorder %v647_v21, 0.0  ;;  %v665_v29 = vmul.f32 0.2, %v647_v21 }
 0x1e9   :  { %vm656_vm11 = vcmp.gt.f32.partialorder %v606_v26, 0.0  ;;  %v664_v30 = vmul.f32 0.2, %v606_v26  ;;  %vm658_vm12 = vcmp.gt.f32.partialorder %v649_v27, 0.0  ;;  %v666_v31 = vmul.f32 0.2, %v649_v27 }
 0x1ea   :  { %v671_v32 = vsel %vm655_vm9, %v604_v12, %v663_v28  ;;  %v673_v33 = vsel %vm657_vm10, %v647_v21, %v665_v29 }
 0x1eb   :  { %v675_v36 = vpack.c.bf16 %v671_v32, %v667_v24  ;;  %v677_v37 = vpack.c.bf16 %v673_v33, %v669_v25  ;;  %v672_v38 = vsel %vm656_vm11, %v606_v26, %v664_v30  ;;  %v674_v39 = vsel %vm658_vm12, %v649_v27, %v666_v31 }
 0x1ec   :  { %v676_v40 = vpack.c.bf16 %v672_v38, %v668_v34  ;;  %v678_v41 = vpack.c.bf16 %v674_v39, %v670_v35 }
 0x1ee   :  { %974 = vmatprep.mubr.bf16.mxu1 %v676_v40  ;;  %1015 = vmatprep.mubr.bf16.mxu0 %v678_v41 }
 0x1ef   :  { %975 = vmatmul.mubr.bf16.vlgmr.msra.gmra.mrb[4].mxu1 %v675_v36  ;;  %1016 = vmatmul.mubr.bf16.vlgmr.msra.gmra.mrb[8].mxu0 %v677_v37 }
 0x2c2   :  { %v1170_v42 = vpop.f32.mrb[4].mxu1  ;;  %v1192_v43 = vpop.f32.mrb[8].mxu0 }
 0x2c3   :  { %v1171_v45 = vpop.f32.mrb[5].mxu1  ;;  %v1193_v46 = vpop.f32.mrb[9].mxu0 }
 0x2c4   :  { %v1172_v47 = vadd.f32 %v1171_v45, %v1170_v42  ;;  %v1194_v48 = vadd.f32 %v1193_v46, %v1192_v43  ;;  %v1173_v49 = vpop.f32.mrb[6].mxu1  ;;  %v1195_v50 = vpop.f32.mrb[10].mxu0 }
 0x2c5   :  { %v1174_v51 = vpop.f32.mrb[7].mxu1  ;;  %v1196_v52 = vpop.f32.mrb[11].mxu0 }
 0x2c6   :  { %v977_v53 = vadd.f32 %v1172_v47, %v1112_v44  ;;  %v1175_v54 = vadd.f32 %v1174_v51, %v1173_v49  ;;  %v1197_v55 = vadd.f32 %v1196_v52, %v1195_v50 }
 0x2c8   :  { %v1018_v56 = vadd.f32 %v1194_v48, %v977_v53  ;;  %v980_v57 = vadd.f32 %v1175_v54, %v1112_v44 }
 0x2ca   :  { %v1021_v58 = vadd.f32 %v1197_v55, %v980_v57  ;;  %1340 = vtanh.f32 %v1018_v56 }
 0x2cc   :  { %1342 = vtanh.f32 %v1021_v58 }
 0x2d4   :  { %v1341_v59 = vpop.eup %1340 }
 0x2d6   :  { %v1343_v60 = vpop.eup %1342 }
 0x2d7   :  { %v1152_v61 = vpack.c.bf16 %v1343_v60, %v1341_v59 }
 0x2d9   :  { %1153 = vst [vmem:[%s1513_s7] sm:$0xff] %v1152_v61  }
 0x2da   :  { %1040 = vsyncpa [#allocation3], 1 }
 0x2db   :  { %1041 = vsyncpa [#allocation5], 1 }

</bundles_post_ra>
